<compile_context>
chip_gen: v5e
topology: v5e:2x2
jax: 0.10.0
libtpu: 0.0.40
codegen_flags: <defaults>
</compile_context>

<pallas_src>
import math
from functools import partial

import jax
import jax.numpy as jnp
from jax.experimental import pallas as pl
from jax.experimental.pallas import tpu as pltpu

LANE = 128      # TPU lane width
SUBLANE = 8


def _round_up(x, m):
    return (x + m - 1) // m * m


def _cdiv(a, b):
    return -(-a // b)


# --------------------------------------------------------------------------
# Parameter packing: one lane-dense [rows, 128] slab holding all weights/biases.
#
# Row layout:
#   [0,            in_rows)        W1       (input_dim x fc1, zero padded)
#   [in_rows,      in_rows+128)    W2       (fc1 x fc2, zero padded to 128x128)
#   [in_rows+128,  in_rows+256)    W_heads  ([Wpi | Wv], fc2 x (n_actions+1), padded)
#   [in_rows+256,  in_rows+264)    biases:  row0 = b1, row1 = b2, row2 = [bpi | bv]
# --------------------------------------------------------------------------
def pack_params(params, input_dim, fc1_dims, fc2_dims, n_actions, dtype=jnp.float32):
    head_w = _round_up(n_actions + 1, SUBLANE)
    assert fc1_dims <= LANE and fc2_dims <= LANE and head_w <= LANE

    in_rows = _round_up(input_dim, SUBLANE)
    w2_off = in_rows
    wh_off = in_rows + LANE
    b_off = in_rows + 2 * LANE
    total_rows = b_off + SUBLANE           # multiple of 8 (and of 16 for bf16 packing)

    slab = jnp.zeros((total_rows, LANE), jnp.float32)
    slab = slab.at[:input_dim, :fc1_dims].set(params["w1"])
    slab = slab.at[w2_off:w2_off + fc1_dims, :fc2_dims].set(params["w2"])
    slab = slab.at[wh_off:wh_off + fc2_dims, :n_actions].set(params["wpi"])
    slab = slab.at[wh_off:wh_off + fc2_dims, n_actions:n_actions + 1].set(params["wv"])
    slab = slab.at[b_off + 0, :fc1_dims].set(params["b1"])
    slab = slab.at[b_off + 1, :fc2_dims].set(params["b2"])
    slab = slab.at[b_off + 2, :n_actions].set(params["bpi"])
    slab = slab.at[b_off + 2, n_actions].set(params["bv"][0])

    layout = dict(in_rows=in_rows, w2_off=w2_off, wh_off=wh_off,
                  b_off=b_off, total_rows=total_rows, head_w=head_w)
    return slab.astype(dtype), layout


# --------------------------------------------------------------------------
# Kernel: one batch tile per grid step, all params resident in a single slab.
# --------------------------------------------------------------------------
def _actor_critic_kernel(x_ref, p_ref, out_ref, *,
                         in_rows, w2_off, wh_off, b_off, head_w):
    x = x_ref[...]                                      # [tile_b, in_rows]

    # One aligned [8, 128] load for all biases, then in-register row slices.
    biases = p_ref[b_off:b_off + SUBLANE, :]
    b1 = biases[0:1, :]
    b2 = biases[1:2, :]
    bh = biases[2:3, :head_w]

    w1 = p_ref[0:in_rows, :]                            # [in_rows, 128]
    h1 = jnp.maximum(
        jnp.dot(x, w1, preferred_element_type=jnp.float32) + b1, 0.0)

    w2 = p_ref[w2_off:w2_off + LANE, :]                 # [128, 128]
    h2 = jnp.maximum(
        jnp.dot(h1, w2, preferred_element_type=jnp.float32) + b2, 0.0)

    wh = p_ref[wh_off:wh_off + LANE, :]                 # [128, 128] fused heads
    heads = jnp.dot(h2, wh, preferred_element_type=jnp.float32)
    # Only the first head_w lanes carry real data (rest is zero padding);
    # narrow the store so writeback traffic is head_w lanes, not 128.
    out_ref[...] = (heads[:, :head_w] + bh).astype(out_ref.dtype)


# --------------------------------------------------------------------------
# Batch-tile selection: multiple of 8, <= max_tile, minimal padding waste, and
# >= target_steps grid steps when the batch is big enough (v7x megacore).
# --------------------------------------------------------------------------
def _choose_tile_b(B, *, max_tile=2048, target_steps=2):
    B8 = _round_up(max(B, 1), SUBLANE)
    if B8 <= SUBLANE:                       # tiny acting batch -> single step
        return B8
    steps = max(target_steps, _cdiv(B8, max_tile))
    tile = max(SUBLANE, (B8 // steps) // SUBLANE * SUBLANE)
    return min(tile, max_tile)


# --------------------------------------------------------------------------
# Wrapper
# --------------------------------------------------------------------------
def actor_critic_forward(x, slab, layout, n_actions, *,
                         max_tile_b=2048, target_steps=2):
    """x: [B, input_dim] float32. Returns (pi_logits [B, n_actions], v [B, 1])."""
    B, in_dim = x.shape
    in_rows = layout["in_rows"]
    total_rows = layout["total_rows"]
    head_w = layout["head_w"]
    compute_dtype = slab.dtype

    tile_b = _choose_tile_b(B, max_tile=max_tile_b, target_steps=target_steps)
    B_pad = _round_up(B, tile_b)
    grid = (B_pad // tile_b,)

    xp = x.astype(compute_dtype)
    if in_dim != in_rows or B_pad != B:
        xp = jnp.pad(xp, ((0, B_pad - B), (0, in_rows - in_dim)))

    kernel = partial(_actor_critic_kernel,
                     in_rows=in_rows, w2_off=layout["w2_off"],
                     wh_off=layout["wh_off"], b_off=layout["b_off"],
                     head_w=head_w)

    item = jnp.dtype(compute_dtype).itemsize
    flops = 2 * B_pad * LANE * (in_rows + 2 * LANE)
    bytes_accessed = (B_pad * in_rows * item          # obs
                      + total_rows * LANE * item      # param slab (resident)
                      + B_pad * head_w * 4)           # narrow fused output

    out = pl.pallas_call(
        kernel,
        out_shape=jax.ShapeDtypeStruct((B_pad, head_w), jnp.float32),
        grid=grid,
        in_specs=[
            pl.BlockSpec((tile_b, in_rows), lambda i: (i, 0)),      # obs tile
            pl.BlockSpec((total_rows, LANE), lambda i: (0, 0)),     # param slab (resident)
        ],
        out_specs=pl.BlockSpec((tile_b, head_w), lambda i: (i, 0)), # narrow fused heads
        compiler_params=pltpu.CompilerParams(
            dimension_semantics=("parallel",)),                     # 2x on v7x megacore
        cost_estimate=pl.CostEstimate(
            flops=flops, transcendentals=0, bytes_accessed=bytes_accessed),
    )(xp, slab)

    pi = out[:B, :n_actions]
    v = out[:B, n_actions:n_actions + 1]
    return pi, v


# --------------------------------------------------------------------------
# PyTorch-style init (nn.Linear default: U(-1/sqrt(fan_in), 1/sqrt(fan_in)))
# Weights stored as [in, out] (transposed vs. PyTorch [out, in]).
# --------------------------------------------------------------------------
def init_params(key, input_dim, fc1_dims, fc2_dims, n_actions):
    def linear(k, fan_in, fan_out):
        bound = 1.0 / math.sqrt(fan_in)
        kw, kb = jax.random.split(k)
        w = jax.random.uniform(kw, (fan_in, fan_out), jnp.float32, -bound, bound)
        b = jax.random.uniform(kb, (fan_out,), jnp.float32, -bound, bound)
        return w, b

    k1, k2, k3, k4 = jax.random.split(key, 4)
    w1, b1 = linear(k1, input_dim, fc1_dims)
    w2, b2 = linear(k2, fc1_dims, fc2_dims)
    wpi, bpi = linear(k3, fc2_dims, n_actions)
    wv, bv = linear(k4, fc2_dims, 1)
    return dict(w1=w1, b1=b1, w2=w2, b2=b2, wpi=wpi, bpi=bpi, wv=wv, bv=bv)


if __name__ == "__main__":
    # Small shapes consistent with the LunarLander actor-critic MLP.
    B, INPUT_DIM, FC1, FC2, N_ACTIONS = 4, 8, 32, 32, 4

    key = jax.random.PRNGKey(0)
    k_obs, k_obs2, k_params = jax.random.split(key, 3)

    params = init_params(k_params, INPUT_DIM, FC1, FC2, N_ACTIONS)
    slab, layout = pack_params(params, INPUT_DIM, FC1, FC2, N_ACTIONS)

    def ref_forward(x):
        h1 = jnp.maximum(x @ params["w1"] + params["b1"], 0.0)
        h2 = jnp.maximum(h1 @ params["w2"] + params["b2"], 0.0)
        return h2 @ params["wpi"] + params["bpi"], h2 @ params["wv"] + params["bv"]

    # 1) tiny acting batch (single grid step, f32 bit parity)
    obs = jax.random.normal(k_obs, (B, INPUT_DIM), jnp.float32)
    pi, v = actor_critic_forward(obs, slab, layout, N_ACTIONS)
    jax.block_until_ready((pi, v))
    assert pi.shape == (B, N_ACTIONS) and pi.dtype == jnp.float32
    assert v.shape == (B, 1) and v.dtype == jnp.float32
    pi_ref, v_ref = ref_forward(obs)
    assert jnp.allclose(pi, pi_ref, atol=1e-5, rtol=1e-5)
    assert jnp.allclose(v, v_ref, atol=1e-5, rtol=1e-5)

    # 2) odd batch -> multi-step grid with minimal padding (tile_b=8, 3 steps)
    B2 = 20
    obs2 = jax.random.normal(k_obs2, (B2, INPUT_DIM), jnp.float32)
    pi2, v2 = actor_critic_forward(obs2, slab, layout, N_ACTIONS)
    jax.block_until_ready((pi2, v2))
    pi2_ref, v2_ref = ref_forward(obs2)
    assert pi2.shape == (B2, N_ACTIONS) and v2.shape == (B2, 1)
    assert jnp.allclose(pi2, pi2_ref, atol=1e-5, rtol=1e-5)
    assert jnp.allclose(v2, v2_ref, atol=1e-5, rtol=1e-5)

    # 3) optional bf16 fast path (halves obs/slab DMA bytes; looser tolerance)
    slab_bf16, layout_bf16 = pack_params(params, INPUT_DIM, FC1, FC2, N_ACTIONS,
                                         dtype=jnp.bfloat16)
    pi3, v3 = actor_critic_forward(obs, slab_bf16, layout_bf16, N_ACTIONS)
    jax.block_until_ready((pi3, v3))
    assert jnp.allclose(pi3, pi_ref, atol=2e-2, rtol=2e-2)
    assert jnp.allclose(v3, v_ref, atol=2e-2, rtol=2e-2)

    print("KERNEL_OK")
</pallas_src>

<mosaic_0001>
module attributes {stable_mosaic.version = 11 : i64} {
  func.func @_actor_critic_kernel(%arg0: i32, %arg1: memref<8x8xf32, #tpu.memory_space<vmem>>, %arg2: memref<272x128xf32, #tpu.memory_space<vmem>>, %arg3: memref<8x8xf32, #tpu.memory_space<vmem>>) attributes {dimension_semantics = [#tpu.dimension_semantics<parallel>], iteration_bounds = array<i64: 1>, scalar_prefetch = 0 : i64, scratch_operands = 0 : i64, tpu.core_type = #tpu.core_type<tc>, window_params = [{transform_indices = @transform_0, window_bounds = array<i64: 8, 8>}, {pipeline_mode = #tpu.pipeline_mode<synchronous>, transform_indices = @transform_1, window_bounds = array<i64: 272, 128>}, {transform_indices = @transform_2, window_bounds = array<i64: 8, 8>}]} {
    %c0 = arith.constant 0 : index
    %c0_0 = arith.constant 0 : index
    %0 = vector.load %arg1[%c0, %c0_0] : memref<8x8xf32, #tpu.memory_space<vmem>>, vector<8x8xf32>
    %c264 = arith.constant 264 : index
    %c0_1 = arith.constant 0 : index
    %1 = vector.load %arg2[%c264, %c0_1] : memref<272x128xf32, #tpu.memory_space<vmem>>, vector<8x128xf32>
    %2 = vector.extract_strided_slice %1 {offsets = [0, 0], sizes = [1, 128], strides = [1, 1]} : vector<8x128xf32> to vector<1x128xf32>
    %3 = vector.extract_strided_slice %1 {offsets = [1, 0], sizes = [1, 128], strides = [1, 1]} : vector<8x128xf32> to vector<1x128xf32>
    %4 = vector.extract_strided_slice %1 {offsets = [2, 0], sizes = [1, 8], strides = [1, 1]} : vector<8x128xf32> to vector<1x8xf32>
    %c0_2 = arith.constant 0 : index
    %c0_3 = arith.constant 0 : index
    %5 = vector.load %arg2[%c0_2, %c0_3] : memref<272x128xf32, #tpu.memory_space<vmem>>, vector<8x128xf32>
    %cst = arith.constant dense<0.000000e+00> : vector<8x128xf32>
    %6 = tpu.matmul %0, %5, %cst {dimension_numbers = #tpu.dot_dimension_numbers<[1], [0], [0], [1], [0, 0, 1, 1], [], []>} : vector<8x8xf32>, vector<8x128xf32>, vector<8x128xf32> -> vector<8x128xf32>
    %7 = vector.broadcast %2 : vector<1x128xf32> to vector<8x128xf32>
    %8 = arith.addf %6, %7 : vector<8x128xf32>
    %cst_4 = arith.constant 0.000000e+00 : f32
    %9 = vector.broadcast %cst_4 : f32 to vector<8x128xf32>
    %10 = arith.maximumf %8, %9 : vector<8x128xf32>
    %c8 = arith.constant 8 : index
    %c0_5 = arith.constant 0 : index
    %11 = vector.load %arg2[%c8, %c0_5] : memref<272x128xf32, #tpu.memory_space<vmem>>, vector<128x128xf32>
    %cst_6 = arith.constant dense<0.000000e+00> : vector<8x128xf32>
    %12 = tpu.matmul %10, %11, %cst_6 {dimension_numbers = #tpu.dot_dimension_numbers<[1], [0], [0], [1], [0, 0, 1, 1], [], []>} : vector<8x128xf32>, vector<128x128xf32>, vector<8x128xf32> -> vector<8x128xf32>
    %13 = vector.broadcast %3 : vector<1x128xf32> to vector<8x128xf32>
    %14 = arith.addf %12, %13 : vector<8x128xf32>
    %cst_7 = arith.constant 0.000000e+00 : f32
    %15 = vector.broadcast %cst_7 : f32 to vector<8x128xf32>
    %16 = arith.maximumf %14, %15 : vector<8x128xf32>
    %c136 = arith.constant 136 : index
    %c0_8 = arith.constant 0 : index
    %17 = vector.load %arg2[%c136, %c0_8] : memref<272x128xf32, #tpu.memory_space<vmem>>, vector<128x128xf32>
    %cst_9 = arith.constant dense<0.000000e+00> : vector<8x128xf32>
    %18 = tpu.matmul %16, %17, %cst_9 {dimension_numbers = #tpu.dot_dimension_numbers<[1], [0], [0], [1], [0, 0, 1, 1], [], []>} : vector<8x128xf32>, vector<128x128xf32>, vector<8x128xf32> -> vector<8x128xf32>
    %19 = vector.extract_strided_slice %18 {offsets = [0, 0], sizes = [8, 8], strides = [1, 1]} : vector<8x128xf32> to vector<8x8xf32>
    %20 = vector.broadcast %4 : vector<1x8xf32> to vector<8x8xf32>
    %21 = arith.addf %19, %20 : vector<8x8xf32>
    %c0_10 = arith.constant 0 : index
    %c0_11 = arith.constant 0 : index
    %22 = vector.load %arg3[%c0_10, %c0_11] : memref<8x8xf32, #tpu.memory_space<vmem>>, vector<8x8xf32>
    tpu.vector_store %arg3[%c0_10, %c0_11], %21 {strides = array<i32>} : memref<8x8xf32, #tpu.memory_space<vmem>>, vector<8x8xf32>,
    return
  }
  func.func @transform_0(%arg0: i32) -> (i32, i32) {
    %c0_i32 = arith.constant 0 : i32
    %c0_i32_0 = arith.constant 0 : i32
    return %arg0, %c0_i32 : i32, i32
  }
  func.func @transform_1(%arg0: i32) -> (i32, i32) {
    %c0_i32 = arith.constant 0 : i32
    %c0_i32_0 = arith.constant 0 : i32
    %c0_i32_1 = arith.constant 0 : i32
    return %c0_i32, %c0_i32_0 : i32, i32
  }
  func.func @transform_2(%arg0: i32) -> (i32, i32) {
    %c0_i32 = arith.constant 0 : i32
    %c0_i32_0 = arith.constant 0 : i32
    return %arg0, %c0_i32 : i32, i32
  }
}

</mosaic_0001>

<bundles_post_ra>
// kernel: tpu_custom_call.1
= control target key start
LH: loop header
LB: loop body
LE: loop exit
PB: predicated region body
PF: predicated region fallthrough
CT: control target
= control target key end

     0   :  { %7 = vsyncpa [#allocation3], 0  ;;  %s281_s0 = inlined_call_operand.hbm [shape: f32[8,8], index: 0, kind: input, shape index: {}]   ;;  %s282_s1 = inlined_call_operand.hbm [shape: f32[272,128], index: 1, kind: input, shape index: {}]   ;;  %s283_s2 = inlined_call_operand.hbm [shape: f32[8,8], index: 2, kind: output, shape index: {}]  }
   0x1   :  { %8 = vsyncpa [#allocation6], 0 }
   0x2   :  { %9 = vsyncpa [#allocation4], 0  ;;  %s15_s11 = sshll.u32 %s281_s0, 4  ;;  %s250_s12 = smov [#allocation2]   ;;  %s16_s11 = int_to_ptr.hbm [resolvable:$true] %s15_s11 }
   0x3   :  { %s17_s13 = sshll.u32 %s250_s12, 4  ;;  %s25_s16 = sshll.u32 %s282_s1, 4  ;;  %s18_s13 = int_to_ptr.vmem [resolvable:$true] %s17_s13  ;;  %s26_s16 = int_to_ptr.hbm [resolvable:$true] %s25_s16 }
   0x4   :  { %20 = dma.hbm_to_vmem [thread:$0]  %s16_s11, 128, %s18_s13, [#allocation3]  }
   0x5   :  { %s251_s17 = smov [#allocation5]   ;;  %s252_s19 = smov 128  }
   0x6   :  { %s27_s18 = sshll.u32 %s251_s17, 4  ;;  %s253_s20 = smov 8   ;;  %s28_s18 = int_to_ptr.vmem [resolvable:$true] %s27_s18 }
   0x7   :  { %33 = dma.hbm_to_vmem [thread:$0]  %s26_s16, 4352, %s28_s18, [#allocation6], %s252_s19, %s252_s19, %s253_s20  }
   0x8   :  { %244 = dma.done.wait [#allocation3], 128  }
   0x9   :  { %245 = vsyncadd [#allocation3], 4294967168 }
   0xa   :  { %246 = dma.done.wait [#allocation6], 4352  }
   0xb   :  { %247 = vsyncadd [#allocation6], 4294962944  ;;  %vm46_vm0 = vcmask 64512   ;;  %v44_v0 = vld [vmem:[#allocation5] sm:$0xff]  ;;  %v42_v1 = vld [vmem:[#allocation2] sm:$0xff]  ;;  %s254_s0 = smov [#allocation7]  }
   0xc   :  { %v86_v2 = vld [vmem:[#allocation5 + $0x80] sm:$0xff]  ;;  %65 = vmatpush.msra.mxu0 %v44_v0  ;;  %v85_v3 = vld [vmem:[#allocation5 + $0x78] sm:$0xff]  ;;  %v84_v4 = vld [vmem:[#allocation5 + $0x70] sm:$0xff]  ;;  %s153_s1 = sshll.u32 %s254_s0, 4  ;;  %s155_s23 = sshll.u32 %s283_s2, 4  ;;  %s154_s1 = int_to_ptr.vmem [resolvable:$true] %s153_s1  ;;  %s156_s23 = int_to_ptr.hbm [resolvable:$true] %s155_s23 }
   0xd   :  { %88 = vmatpush.msra.mxu1 %v86_v2  ;;  %166 = vmatmul.msk.f32.vlgmr.msra.gmra.mxu0 %vm46_vm0, %v42_v1  ;;  %v83_v5 = vld [vmem:[#allocation5 + $0x68] sm:$0xff]  ;;  %v82_v6 = vld [vmem:[#allocation5 + $0x60] sm:$0xff]  ;;  %v81_v7 = vld [vmem:[#allocation5 + $0x58] sm:$0xff] }
   0xe   :  { %v80_v8 = vld [vmem:[#allocation5 + $0x50] sm:$0xff]  ;;  %v79_v9 = vld [vmem:[#allocation5 + $0x48] sm:$0xff]  ;;  %v78_v10 = vld [vmem:[#allocation5 + $0x40] sm:$0xff] }
   0xf   :  { %89 = vmatpush.msra.mxu1 %v85_v3  ;;  %v77_v11 = vld [vmem:[#allocation5 + $0x38] sm:$0xff]  ;;  %v76_v12 = vld [vmem:[#allocation5 + $0x30] sm:$0xff]  ;;  %v75_v13 = vld [vmem:[#allocation5 + $0x28] sm:$0xff] }
  0x10   :  { %v74_v14 = vld [vmem:[#allocation5 + $0x20] sm:$0xff]  ;;  %v73_v15 = vld [vmem:[#allocation5 + $0x18] sm:$0xff]  ;;  %v72_v16 = vld [vmem:[#allocation5 + $0x10] sm:$0xff] }
  0x11   :  { %90 = vmatpush.msra.mxu1 %v84_v4  ;;  %v71_v17 = vld [vmem:[#allocation5 + $0x8] sm:$0xff]  ;;  %v124_v18 = vld [vmem:[#allocation5 + $0x100] sm:$0xff]  ;;  %v123_v19 = vld [vmem:[#allocation5 + $0xf8] sm:$0xff] }
  0x12   :  { %125 = vmatpush.msra.mxu2 %v124_v18  ;;  %v122_v20 = vld [vmem:[#allocation5 + $0xf0] sm:$0xff]  ;;  %v121_v21 = vld [vmem:[#allocation5 + $0xe8] sm:$0xff]  ;;  %v120_v22 = vld [vmem:[#allocation5 + $0xe0] sm:$0xff] }
  0x13   :  { %91 = vmatpush.msra.mxu1 %v83_v5  ;;  %v119_v23 = vld [vmem:[#allocation5 + $0xd8] sm:$0xff]  ;;  %v118_v24 = vld [vmem:[#allocation5 + $0xd0] sm:$0xff]  ;;  %v117_v25 = vld [vmem:[#allocation5 + $0xc8] sm:$0xff] }
  0x14   :  { %126 = vmatpush.msra.mxu2 %v123_v19  ;;  %v116_v26 = vld [vmem:[#allocation5 + $0xc0] sm:$0xff]  ;;  %v115_v27 = vld [vmem:[#allocation5 + $0xb8] sm:$0xff]  ;;  %v114_v28 = vld [vmem:[#allocation5 + $0xb0] sm:$0xff] }
  0x15   :  { %92 = vmatpush.msra.mxu1 %v82_v6  ;;  %v113_v29 = vld [vmem:[#allocation5 + $0xa8] sm:$0xff]  ;;  %v112_v31 = vld [vmem:[#allocation5 + $0xa0] sm:$0xff]  ;;  %v111_v36 = vld [vmem:[#allocation5 + $0x98] sm:$0xff] }
  0x16   :  { %127 = vmatpush.msra.mxu2 %v122_v20  ;;  %v43_v30 = vld [vmem:[#allocation5 + $0x108] sm:$0xff]  ;;  %v110_v37 = vld [vmem:[#allocation5 + $0x90] sm:$0xff] }
  0x17   :  { %93 = vmatpush.msra.mxu1 %v81_v7  ;;  %v45_v32 = vperm.slane %v43_v30, 0  ;;  %v109_v38 = vld [vmem:[#allocation5 + $0x88] sm:$0xff]  ;;  %v87_v39 = vperm.slane %v43_v30, 1  ;;  %v145_v43 = vperm.slane %v43_v30, 2 }
  0x18   :  { %128 = vmatpush.msra.mxu2 %v121_v21 }
  0x19   :  { %94 = vmatpush.msra.mxu1 %v80_v8 }
  0x1a   :  { %129 = vmatpush.msra.mxu2 %v120_v22 }
  0x1b   :  { %95 = vmatpush.msra.mxu1 %v79_v9 }
  0x1c   :  { %130 = vmatpush.msra.mxu2 %v119_v23 }
  0x1d   :  { %96 = vmatpush.msra.mxu1 %v78_v10 }
  0x1e   :  { %131 = vmatpush.msra.mxu2 %v118_v24 }
  0x1f   :  { %97 = vmatpush.msra.mxu1 %v77_v11 }
  0x20   :  { %132 = vmatpush.msra.mxu2 %v117_v25 }
  0x21   :  { %98 = vmatpush.msra.mxu1 %v76_v12 }
  0x22   :  { %133 = vmatpush.msra.mxu2 %v116_v26 }
  0x23   :  { %99 = vmatpush.msra.mxu1 %v75_v13 }
  0x24   :  { %134 = vmatpush.msra.mxu2 %v115_v27 }
  0x25   :  { %100 = vmatpush.msra.mxu1 %v74_v14 }
  0x26   :  { %135 = vmatpush.msra.mxu2 %v114_v28 }
  0x27   :  { %101 = vmatpush.msra.mxu1 %v73_v15 }
  0x28   :  { %136 = vmatpush.msra.mxu2 %v113_v29 }
  0x29   :  { %102 = vmatpush.msra.mxu1 %v72_v16 }
  0x2a   :  { %137 = vmatpush.msra.mxu2 %v112_v31 }
  0x2b   :  { %103 = vmatpush.msra.mxu1 %v71_v17 }
  0x2c   :  { %138 = vmatpush.msra.mxu2 %v111_v36 }
  0x2e   :  { %139 = vmatpush.msra.mxu2 %v110_v37 }
  0x30   :  { %140 = vmatpush.msra.mxu2 %v109_v38 }
  0x8a   :  { %v67_v33 = vpop.f32.mrf.mxu0 }
  0x8b   :  { %v68_v34 = vadd.f32 %v67_v33, %v45_v32 }
  0x8d   :  { %v70_v35 = vmax.f32 %v68_v34, 0.0 }
  0x8f   :  { %104 = vmatmul.f32.vlgmr.msra.gmra.mxu1 %v70_v35 }
 0x10c   :  { %v105_v40 = vpop.f32.mrf.mxu1 }
 0x10d   :  { %v106_v41 = vadd.f32 %v105_v40, %v87_v39 }
 0x10f   :  { %v108_v42 = vmax.f32 %v106_v41, 0.0 }
 0x111   :  { %141 = vmatmul.f32.vlgmr.msra.gmra.mxu2 %v108_v42 }
 0x194   :  { %v142_v44 = vpop.f32.mrf.mxu2 }
 0x195   :  { %v146_v45 = vadd.f32 %v145_v43, %v142_v44 }
 0x197   :  { %147 = vst.msk [vmem:[#allocation7] sm:$0xff] %vm46_vm0, %v146_v45 }
 0x198   :  { %158 = dma.vmem_to_hbm [thread:$0]  %s154_s1, 128, %s156_s23, [#allocation4]  }
 0x199   :  { %248 = dma.done.wait [#allocation4], 128  }
 0x19a   :  { %249 = vsyncadd [#allocation4], 4294967168 }
 0x19b   :  { %163 = vsyncpa [#allocation3], 1 }
 0x19c   :  { %164 = vsyncpa [#allocation6], 1 }
 0x19d   :  { %165 = vsyncpa [#allocation4], 1 }

</bundles_post_ra>
